<compile_context>
chip_gen: v7x
topology: tpu7x:2x2x1
jax: 0.10.0
libtpu: 0.0.40
codegen_flags: <defaults>
</compile_context>

<pallas_src>
import jax
import jax.numpy as jnp
from jax.experimental import pallas as pl

# ----------------------------- problem sizes -------------------------------
B = 2            # batch (per view)
C_IN = 4         # input channels
H = W = 16       # spatial
N_FEATURES = 32  # encoder feature dim (n_features), F
PROJ_DIM = 16    # projection_dim, P
KH = KW = 3      # conv kernel
N_VIEWS = 2      # (x_i, x_j)

K_COL = KH * KW * C_IN          # 36   im2col contraction dim
HW = H * W                      # 256  spatial positions per sample
B_TOTAL = N_VIEWS * B           # 4    stacked views * batch
M_TOTAL = B_TOTAL * HW          # 1024 activation columns (lane axis)
OUT_ROWS = N_FEATURES + PROJ_DIM  # 48 packed [h^T ; z^T] output rows


# ------------------------------- kernel ------------------------------------
def simclr_kernel(patch_ref, wct_ref, bc_ref, poolt_ref, w1_ref, w2_ref,
                  hz_ref):
    """Fused encoder + projector, both views stacked, transposed layout.

    patch_ref : (K_COL, M_TOTAL)   im2col patches^T (M on lanes)
    wct_ref   : (F, K_COL)         flattened conv weight, transposed
    bc_ref    : (F, 1)             conv bias (broadcast along lanes)
    poolt_ref : (M_TOTAL, B_TOTAL) block-diagonal 1/(H*W) mean-pool matrix^T
    w1_ref    : (F, F)             projector W1 (PyTorch layout; used as W1 @ h^T)
    w2_ref    : (P, F)             projector W2
    hz_ref    : (F+P, B_TOTAL)     packed output: rows [0,F) = h^T, [F,F+P) = z^T
    """
    # Conv as one lane-dense im2col matmul: (F,K)@(K,M) -> (32, 1024).
    acc = jnp.dot(wct_ref[...], patch_ref[...],
                  preferred_element_type=jnp.float32)
    # Bias (lane-broadcast) + ReLU on the (32, 1024) slab.
    acc = jnp.maximum(acc + bc_ref[...], 0.0)

    # Global average pool on the MXU: (F, M) @ (M, B_total) -> (32, 4).
    h_t = jnp.dot(acc, poolt_ref[...], preferred_element_type=jnp.float32)

    # Projector (transposed): z1^T = ReLU(W1 @ h^T); z^T = W2 @ z1^T.
    z1_t = jnp.maximum(
        jnp.dot(w1_ref[...], h_t, preferred_element_type=jnp.float32), 0.0)
    z_t = jnp.dot(w2_ref[...], z1_t, preferred_element_type=jnp.float32)

    # Single packed output slab (one writeback DMA).
    hz_ref[0:N_FEATURES, :] = h_t.astype(hz_ref.dtype)
    hz_ref[N_FEATURES:, :] = z_t.astype(hz_ref.dtype)


# ------------------------------- wrapper ------------------------------------
def _im2col_t(x_nchw):
    """NCHW image batch -> (KH*KW*C_IN, N*H*W) transposed im2col matrix."""
    n = x_nchw.shape[0]
    x = jnp.transpose(x_nchw, (0, 2, 3, 1)).astype(jnp.float32)   # NHWC
    xp = jnp.pad(x, ((0, 0), (1, 1), (1, 1), (0, 0)))
    cols = []
    for dy in range(KH):          # column order: (dy, dx, channel)
        for dx in range(KW):
            cols.append(xp[:, dy:dy + H, dx:dx + W, :])           # (N,H,W,C)
    patches = jnp.concatenate(cols, axis=-1)                      # (N,H,W,9C)
    return patches.reshape(n * HW, K_COL).T                       # (K, N*HW)


@jax.jit
def simclr_forward(x_i, x_j, conv_w, conv_b, w1, w2):
    """x_i, x_j: NCHW float32. Returns (h_i, h_j, z_i, z_j)."""
    # --- layout glue (plain JAX) ---
    x_all = jnp.concatenate([x_i, x_j], axis=0)                   # (2B,C,H,W)
    patches_t = _im2col_t(x_all)                                  # (36, 1024)

    # conv_w is HWIO (3,3,C_IN,F); reshape(K_COL, F) flattens in (kh, kw, c)
    # order, which MUST match the (dy, dx, channel) loop order in _im2col_t.
    wct = conv_w.reshape(K_COL, N_FEATURES).T.astype(jnp.float32)  # (32, 36)
    bc = conv_b.reshape(N_FEATURES, 1).astype(jnp.float32)         # (32, 1)

    # Transposed block-diagonal mean-pool matrix: column b averages lanes
    # [b*HW, (b+1)*HW).  1/256 is exactly representable.
    pool_t = jnp.repeat(jnp.eye(B_TOTAL, dtype=jnp.float32),
                        HW, axis=0) / HW                           # (1024, 4)

    flops = 2 * (N_FEATURES * K_COL * M_TOTAL
                 + N_FEATURES * M_TOTAL * B_TOTAL
                 + N_FEATURES * N_FEATURES * B_TOTAL
                 + PROJ_DIM * N_FEATURES * B_TOTAL)
    bytes_accessed = 4 * (patches_t.size + wct.size + bc.size + pool_t.size
                          + w1.size + w2.size + OUT_ROWS * B_TOTAL)

    # Single grid-less invocation: whole problem resident in VMEM.
    hz = pl.pallas_call(
        simclr_kernel,
        out_shape=jax.ShapeDtypeStruct((OUT_ROWS, B_TOTAL), jnp.float32),
        cost_estimate=pl.CostEstimate(flops=flops, transcendentals=0,
                                      bytes_accessed=bytes_accessed),
    )(patches_t, wct, bc, pool_t,
      w1.astype(jnp.float32), w2.astype(jnp.float32))

    # Un-transpose / unpack the tiny result slab in the wrapper.
    hz = hz.T                                                      # (4, 48)
    h_all = hz[:, :N_FEATURES]                                     # (4, 32)
    z_all = hz[:, N_FEATURES:]                                     # (4, 16)
    return h_all[:B], h_all[B:], z_all[:B], z_all[B:]


# ------------------------- pure-JAX reference -------------------------------
def simclr_reference(x_i, x_j, conv_w, conv_b, w1, w2):
    def enc(x):  # x: NCHW
        x = jnp.transpose(x, (0, 2, 3, 1)).astype(jnp.float32)    # NHWC
        y = jax.lax.conv_general_dilated(
            x, conv_w.astype(jnp.float32), (1, 1), 'SAME',
            dimension_numbers=('NHWC', 'HWIO', 'NHWC')) + conv_b
        y = jnp.maximum(y, 0.0)
        return jnp.mean(y, axis=(1, 2))                           # (B, F)

    def proj(h):
        return jnp.maximum(h @ w1.T, 0.0) @ w2.T

    h_i, h_j = enc(x_i), enc(x_j)
    return h_i, h_j, proj(h_i), proj(h_j)


# --------------------------------- main --------------------------------------
if __name__ == "__main__":
    key = jax.random.PRNGKey(0)
    kxi, kxj, kwc, kbc, kw1, kw2 = jax.random.split(key, 6)

    # Deterministic inputs (NCHW, like PyTorch) and parameters.
    x_i = jax.random.normal(kxi, (B, C_IN, H, W), jnp.float32)
    x_j = jax.random.normal(kxj, (B, C_IN, H, W), jnp.float32)

    conv_w = 0.1 * jax.random.normal(
        kwc, (KH, KW, C_IN, N_FEATURES), jnp.float32)             # HWIO
    conv_b = 0.1 * jax.random.normal(kbc, (N_FEATURES,), jnp.float32)
    # nn.Linear weights, PyTorch convention (out_features, in_features), no bias.
    w1 = 0.1 * jax.random.normal(kw1, (N_FEATURES, N_FEATURES), jnp.float32)
    w2 = 0.1 * jax.random.normal(kw2, (PROJ_DIM, N_FEATURES), jnp.float32)

    outs = simclr_forward(x_i, x_j, conv_w, conv_b, w1, w2)
    outs = jax.block_until_ready(outs)

    refs = simclr_reference(x_i, x_j, conv_w, conv_b, w1, w2)
    names = ("h_i", "h_j", "z_i", "z_j")
    for name, got, want in zip(names, outs, refs):
        assert got.shape == want.shape, (name, got.shape, want.shape)
        assert jnp.allclose(got, want, atol=1e-4, rtol=1e-4), (
            f"{name} mismatch: max abs err "
            f"{float(jnp.max(jnp.abs(got - want)))}")

    print("KERNEL_OK")
</pallas_src>

<mosaic_0001>
module attributes {stable_mosaic.version = 11 : i64} {
  func.func @simclr_kernel(%arg0: memref<36x1024xf32, #tpu.memory_space<vmem>>, %arg1: memref<32x36xf32, #tpu.memory_space<vmem>>, %arg2: memref<32x1xf32, #tpu.memory_space<vmem>>, %arg3: memref<1024x4xf32, #tpu.memory_space<vmem>>, %arg4: memref<32x32xf32, #tpu.memory_space<vmem>>, %arg5: memref<16x32xf32, #tpu.memory_space<vmem>>, %arg6: memref<48x4xf32, #tpu.memory_space<vmem>>) attributes {dimension_semantics = [], scalar_prefetch = 0 : i64, scratch_operands = 0 : i64, tpu.core_type = #tpu.core_type<tc>} {
    %c0 = arith.constant 0 : index
    %c0_0 = arith.constant 0 : index
    %0 = vector.load %arg1[%c0, %c0_0] : memref<32x36xf32, #tpu.memory_space<vmem>>, vector<32x36xf32>
    %c0_1 = arith.constant 0 : index
    %c0_2 = arith.constant 0 : index
    %1 = vector.load %arg0[%c0_1, %c0_2] : memref<36x1024xf32, #tpu.memory_space<vmem>>, vector<36x1024xf32>
    %cst = arith.constant dense<0.000000e+00> : vector<32x1024xf32>
    %2 = tpu.matmul %0, %1, %cst {dimension_numbers = #tpu.dot_dimension_numbers<[1], [0], [0], [1], [0, 0, 1, 1], [], []>} : vector<32x36xf32>, vector<36x1024xf32>, vector<32x1024xf32> -> vector<32x1024xf32>
    %c0_3 = arith.constant 0 : index
    %c0_4 = arith.constant 0 : index
    %3 = vector.load %arg2[%c0_3, %c0_4] : memref<32x1xf32, #tpu.memory_space<vmem>>, vector<32x1xf32>
    %4 = vector.broadcast %3 : vector<32x1xf32> to vector<32x1024xf32>
    %5 = arith.addf %2, %4 : vector<32x1024xf32>
    %cst_5 = arith.constant 0.000000e+00 : f32
    %6 = vector.broadcast %cst_5 : f32 to vector<32x1024xf32>
    %7 = arith.maximumf %5, %6 : vector<32x1024xf32>
    %c0_6 = arith.constant 0 : index
    %c0_7 = arith.constant 0 : index
    %8 = vector.load %arg3[%c0_6, %c0_7] : memref<1024x4xf32, #tpu.memory_space<vmem>>, vector<1024x4xf32>
    %cst_8 = arith.constant dense<0.000000e+00> : vector<32x4xf32>
    %9 = tpu.matmul %7, %8, %cst_8 {dimension_numbers = #tpu.dot_dimension_numbers<[1], [0], [0], [1], [0, 0, 1, 1], [], []>} : vector<32x1024xf32>, vector<1024x4xf32>, vector<32x4xf32> -> vector<32x4xf32>
    %c0_9 = arith.constant 0 : index
    %c0_10 = arith.constant 0 : index
    %10 = vector.load %arg4[%c0_9, %c0_10] : memref<32x32xf32, #tpu.memory_space<vmem>>, vector<32x32xf32>
    %cst_11 = arith.constant dense<0.000000e+00> : vector<32x4xf32>
    %11 = tpu.matmul %10, %9, %cst_11 {dimension_numbers = #tpu.dot_dimension_numbers<[1], [0], [0], [1], [0, 0, 1, 1], [], []>} : vector<32x32xf32>, vector<32x4xf32>, vector<32x4xf32> -> vector<32x4xf32>
    %cst_12 = arith.constant 0.000000e+00 : f32
    %12 = vector.broadcast %cst_12 : f32 to vector<32x4xf32>
    %13 = arith.maximumf %11, %12 : vector<32x4xf32>
    %c0_13 = arith.constant 0 : index
    %c0_14 = arith.constant 0 : index
    %14 = vector.load %arg5[%c0_13, %c0_14] : memref<16x32xf32, #tpu.memory_space<vmem>>, vector<16x32xf32>
    %cst_15 = arith.constant dense<0.000000e+00> : vector<16x4xf32>
    %15 = tpu.matmul %14, %13, %cst_15 {dimension_numbers = #tpu.dot_dimension_numbers<[1], [0], [0], [1], [0, 0, 1, 1], [], []>} : vector<16x32xf32>, vector<32x4xf32>, vector<16x4xf32> -> vector<16x4xf32>
    %c0_16 = arith.constant 0 : index
    %c0_17 = arith.constant 0 : index
    %16 = vector.load %arg6[%c0_16, %c0_17] : memref<48x4xf32, #tpu.memory_space<vmem>>, vector<32x4xf32>
    tpu.vector_store %arg6[%c0_16, %c0_17], %9 {strides = array<i32>} : memref<48x4xf32, #tpu.memory_space<vmem>>, vector<32x4xf32>,
    %c32 = arith.constant 32 : index
    %c0_18 = arith.constant 0 : index
    %17 = vector.load %arg6[%c32, %c0_18] : memref<48x4xf32, #tpu.memory_space<vmem>>, vector<16x4xf32>
    tpu.vector_store %arg6[%c32, %c0_18], %15 {strides = array<i32>} : memref<48x4xf32, #tpu.memory_space<vmem>>, vector<16x4xf32>,
    return
  }
}

</mosaic_0001>

<bundles_post_ra>
// kernel: simclr_forward.1
= control target key start
LH: loop header
LB: loop body
LE: loop exit
PB: predicated region body
PF: predicated region fallthrough
CT: control target
= control target key end

     0   :  { %v1610_v3 = vmov 0.0   ;;  %v1611_v8 = vmov 0   ;;  %vm104_vm0 = vcmask 1043456   ;;  %vm91_vm1 = vcmask 293888   ;;  %s2339_s0 = inlined_call_operand.vmem [shape: f32[36,1024], index: 0, kind: input, shape index: {}]   ;;  %s2340_s1 = inlined_call_operand.vmem [shape: f32[32,36], index: 1, kind: input, shape index: {}]   ;;  %s2341_s3 = inlined_call_operand.vmem [shape: f32[1024,4], index: 3, kind: input, shape index: {}]   ;;  %s2342_s2 = inlined_call_operand.vmem [shape: f32[32,1], index: 2, kind: input, shape index: {}]   ;;  %s2343_s4 = inlined_call_operand.vmem [shape: f32[32,32], index: 4, kind: input, shape index: {}]   ;;  %s2344_s6 = inlined_call_operand.vmem [shape: f32[48,4], index: 6, kind: output, shape index: {}]   ;;  %s2345_s5 = inlined_call_operand.vmem [shape: f32[16,32], index: 5, kind: input, shape index: {}]  }
   0x1   :  { %v28_v0 = vld [vmem:[%s2339_s0 + $0x8] sm:$0xff]  ;;  %v30_v2 = vld [vmem:[%s2339_s0 + $0x18] sm:$0xff]  ;;  %193 = vmatprep.mubr.f32.mxu0 %v1610_v3  ;;  %282 = vmatprep.mubr.f32.mxu1 %v1610_v3  ;;  %v27_v6 = vld [vmem:[%s2339_s0] sm:$0xff]  ;;  %vm989_vm2 = vcmask 261120   ;;  %vm1174_vm3 = vcmask 31744  }
   0x2   :  { %v36_v1 = vld [vmem:[%s2339_s0 + $0x48] sm:$0xff]  ;;  %v38_v5 = vld [vmem:[%s2339_s0 + $0x58] sm:$0xff]  ;;  %v35_v7 = vld [vmem:[%s2339_s0 + $0x40] sm:$0xff]  ;;  %1608 = vset.pattern.permute.xlu0 %v1611_v8  ;;  %1609 = vset.pattern.permute.xlu1 %v1611_v8 }
   0x3   :  { %v1430_v4 = vpack.c.bf16 %v36_v1, %v28_v0  ;;  %v1438_v9 = vpack.c.bf16 %v38_v5, %v30_v2  ;;  %v1432_v10 = vpack.c.bf16 %v35_v7, %v27_v6  ;;  %v29_v11 = vld [vmem:[%s2339_s0 + $0x10] sm:$0xff]  ;;  %v44_v13 = vld [vmem:[%s2339_s0 + $0x88] sm:$0xff]  ;;  %v46_v16 = vld [vmem:[%s2339_s0 + $0x98] sm:$0xff] }
   0x4   :  { %v37_v12 = vld [vmem:[%s2339_s0 + $0x50] sm:$0xff]  ;;  %v52_v15 = vld [vmem:[%s2339_s0 + $0xc8] sm:$0xff]  ;;  %v54_v17 = vld [vmem:[%s2339_s0 + $0xd8] sm:$0xff] }
   0x5   :  { %1431 = vmatprep.subr.bf16.mxu0 %v1430_v4  ;;  %v1440_v14 = vpack.c.bf16 %v37_v12, %v29_v11  ;;  %1439 = vmatprep.subr.bf16.mxu1 %v1438_v9  ;;  %v1434_v18 = vpack.c.bf16 %v52_v15, %v44_v13  ;;  %v1442_v19 = vpack.c.bf16 %v54_v17, %v46_v16  ;;  %v43_v20 = vld [vmem:[%s2339_s0 + $0x80] sm:$0xff]  ;;  %v45_v22 = vld [vmem:[%s2339_s0 + $0x90] sm:$0xff]  ;;  %v60_v26 = vld [vmem:[%s2339_s0 + $0x108] sm:$0xf] }
   0x6   :  { %1433 = vmatpush1.bf16.msra.mxu0 %v1432_v10  ;;  %v51_v21 = vld [vmem:[%s2339_s0 + $0xc0] sm:$0xff]  ;;  %v53_v24 = vld [vmem:[%s2339_s0 + $0xd0] sm:$0xff]  ;;  %v62_v27 = vld [vmem:[%s2339_s0 + $0x118] sm:$0xf] }
   0x7   :  { %1441 = vmatpush1.bf16.msra.mxu1 %v1440_v14  ;;  %v1436_v23 = vpack.c.bf16 %v51_v21, %v43_v20  ;;  %1435 = vmatprep.subr.bf16.mxu0 %v1434_v18  ;;  %v1444_v25 = vpack.c.bf16 %v53_v24, %v45_v22  ;;  %v59_v28 = vld [vmem:[%s2339_s0 + $0x100] sm:$0xf]  ;;  %v61_v29 = vld [vmem:[%s2339_s0 + $0x110] sm:$0xf]  ;;  %v32_v30 = vld [vmem:[%s2339_s0 + $0x28] sm:$0xff] }
   0x8   :  { %1443 = vmatprep.subr.bf16.mxu1 %v1442_v19  ;;  %v40_v31 = vld [vmem:[%s2339_s0 + $0x68] sm:$0xff]  ;;  %v34_v32 = vld [vmem:[%s2339_s0 + $0x38] sm:$0xff]  ;;  %v31_v34 = vld [vmem:[%s2339_s0 + $0x20] sm:$0xff] }
   0x9   :  { %v42_v33 = vld [vmem:[%s2339_s0 + $0x78] sm:$0xff]  ;;  %v39_v35 = vld [vmem:[%s2339_s0 + $0x60] sm:$0xff]  ;;  %v33_v37 = vld [vmem:[%s2339_s0 + $0x30] sm:$0xff]  ;;  %v1446_v39 = vpack.c.bf16 %v40_v31, %v32_v30 }
   0xa   :  { %1437 = vmatpush1.bf16.msra.mxu0 %v1436_v23  ;;  %v1732_v36 = vld [vmem:[%s2340_s1] sm:$0xff]  ;;  %v41_v38 = vld [vmem:[%s2339_s0 + $0x70] sm:$0xff]  ;;  %v1454_v40 = vpack.c.bf16 %v42_v33, %v34_v32  ;;  %v1448_v41 = vpack.c.bf16 %v39_v35, %v31_v34  ;;  %v48_v42 = vld [vmem:[%s2339_s0 + $0xa8] sm:$0xff] }
   0xb   :  { %1445 = vmatpush1.bf16.msra.mxu1 %v1444_v25  ;;  %1185 = vmatprep.subr.msk.mxu0 %vm104_vm0, %v60_v26  ;;  %v56_v43 = vld [vmem:[%s2339_s0 + $0xe8] sm:$0xff]  ;;  %v50_v44 = vld [vmem:[%s2339_s0 + $0xb8] sm:$0xff]  ;;  %v1456_v45 = vpack.c.bf16 %v41_v38, %v33_v37  ;;  %v47_v47 = vld [vmem:[%s2339_s0 + $0xa0] sm:$0xff] }
   0xc   :  { %1191 = vmatprep.subr.msk.mxu1 %vm104_vm0, %v62_v27  ;;  %v58_v46 = vld [vmem:[%s2339_s0 + $0xf8] sm:$0xff]  ;;  %v55_v48 = vld [vmem:[%s2339_s0 + $0xe0] sm:$0xff]  ;;  %v1768_v49 = vld [vmem:[%s2340_s1 + $0x8] sm:$0xff]  ;;  %v1450_v52 = vpack.c.bf16 %v56_v43, %v48_v42 }
   0xd   :  { %v49_v50 = vld [vmem:[%s2339_s0 + $0xb0] sm:$0xff]  ;;  %v1458_v53 = vpack.c.bf16 %v58_v46, %v50_v44  ;;  %v1452_v54 = vpack.c.bf16 %v55_v48, %v47_v47  ;;  %v1791_v57 = vld [vmem:[%s2340_s1 + $0x18] sm:$0xff]  ;;  %v64_v58 = vld [vmem:[%s2339_s0 + $0x128] sm:$0xf] }
   0xe   :  { %1186 = vmatpush1.msk.msra.mxu0 %vm104_vm0, %v59_v28  ;;  %v57_v51 = vld [vmem:[%s2339_s0 + $0xf0] sm:$0xff]  ;;  %v66_v59 = vld [vmem:[%s2339_s0 + $0x138] sm:$0xf]  ;;  %v63_v60 = vld [vmem:[%s2339_s0 + $0x120] sm:$0xf] }
   0xf   :  { %1192 = vmatpush1.msk.msra.mxu1 %vm104_vm0, %v61_v29  ;;  %1187 = vmatmul.mubr.msk.f32.vlgmr.msra.gmra.mrb[0].mxu0 %vm91_vm1, %v1732_v36  ;;  %v1460_v55 = vpack.c.bf16 %v57_v51, %v49_v50  ;;  %v1785_v56 = vld [vmem:[%s2340_s1 + $0x10] sm:$0xff]  ;;  %v533_v61 = vld [vmem:[%s2341_s3 + $0x80] sm:$0xff]  ;;  %v534_v62 = vld [vmem:[%s2341_s3 + $0x88] sm:$0xff] }
  0x10   :  { %1193 = vmatmul.mubr.msk.f32.vlgmr.msra.gmra.mrb[0].mxu1 %vm91_vm1, %v1732_v36  ;;  %199 = vmatprep.mubr.f32.mxu0 %v1610_v3  ;;  %v65_v63 = vld [vmem:[%s2339_s0 + $0x130] sm:$0xf]  ;;  %v565_v0 = vld [vmem:[%s2341_s3 + $0x180] sm:$0xff]  ;;  %v566_v1 = vld [vmem:[%s2341_s3 + $0x188] sm:$0xff]  ;;  %v1462_v4 = vpack.c.bf16 %v534_v62, %v533_v61 }
  0x11   :  { %288 = vmatprep.mubr.f32.mxu1 %v1610_v3  ;;  %1447 = vmatprep.subr.bf16.mxu0 %v1446_v39  ;;  %v67_v2 = vld [vmem:[%s2342_s2] sm:$0xff]  ;;  %v69_v5 = vld [vmem:[%s2342_s2 + $0x10] sm:$0xff]  ;;  %v1494_v6 = vpack.c.bf16 %v566_v1, %v565_v0  ;;  %v518_v8 = vld [vmem:[%s2341_s3 + $0x8] sm:$0xff] }
  0x12   :  { %1455 = vmatprep.subr.bf16.mxu1 %v1454_v40  ;;  %1449 = vmatpush1.bf16.msra.mxu0 %v1448_v41  ;;  %v517_v7 = vld [vmem:[%s2341_s3] sm:$0xff]  ;;  %v550_v10 = vld [vmem:[%s2341_s3 + $0x108] sm:$0xff]  ;;  %v70_v12 = vld [vmem:[%s2342_s2 + $0x18] sm:$0xff] }
  0x13   :  { %1188 = vmatmul.mubr.msk.f32.gmra.mrb[2].mxu0 %vm91_vm1, %v1768_v49  ;;  %1457 = vmatpush1.bf16.msra.mxu1 %v1456_v45  ;;  %v549_v9 = vld [vmem:[%s2341_s3 + $0x100] sm:$0xff]  ;;  %v68_v11 = vld [vmem:[%s2342_s2 + $0x8] sm:$0xff]  ;;  %v1464_v13 = vpack.c.bf16 %v518_v8, %v517_v7  ;;  %v535_v14 = vld [vmem:[%s2341_s3 + $0x90] sm:$0xff] }
  0x14   :  { %1194 = vmatmul.mubr.msk.f32.gmra.mrb[2].mxu1 %vm91_vm1, %v1768_v49  ;;  %205 = vmatprep.mubr.f32.mxu0 %v1610_v3  ;;  %v536_v15 = vld [vmem:[%s2341_s3 + $0x98] sm:$0xff]  ;;  %v567_v16 = vld [vmem:[%s2341_s3 + $0x190] sm:$0xff]  ;;  %v1496_v17 = vpack.c.bf16 %v550_v10, %v549_v9  ;;  %v537_v26 = vld [vmem:[%s2341_s3 + $0xa0] sm:$0xff] }
  0x15   :  { %294 = vmatprep.mubr.f32.mxu1 %v1610_v3  ;;  %1451 = vmatprep.subr.bf16.mxu0 %v1450_v52  ;;  %v568_v18 = vld [vmem:[%s2341_s3 + $0x198] sm:$0xff]  ;;  %v519_v19 = vld [vmem:[%s2341_s3 + $0x10] sm:$0xff]  ;;  %v1466_v23 = vpack.c.bf16 %v536_v15, %v535_v14  ;;  %v538_v27 = vld [vmem:[%s2341_s3 + $0xa8] sm:$0xff] }
  0x16   :  { %1459 = vmatprep.subr.bf16.mxu1 %v1458_v53  ;;  %1453 = vmatpush1.bf16.msra.mxu0 %v1452_v54  ;;  %v520_v20 = vld [vmem:[%s2341_s3 + $0x18] sm:$0xff]  ;;  %v551_v21 = vld [vmem:[%s2341_s3 + $0x110] sm:$0xff]  ;;  %v1498_v24 = vpack.c.bf16 %v568_v18, %v567_v16  ;;  %v569_v28 = vld [vmem:[%s2341_s3 + $0x1a0] sm:$0xff]  ;;  %v1470_v35 = vpack.c.bf16 %v538_v27, %v537_v26 }
  0x17   :  { %1189 = vmatmul.mubr.msk.f32.gmra.mrb[4].mxu0 %vm91_vm1, %v1785_v56  ;;  %1461 = vmatpush1.bf16.msra.mxu1 %v1460_v55  ;;  %v552_v22 = vld [vmem:[%s2341_s3 + $0x118] sm:$0xff]  ;;  %v1468_v25 = vpack.c.bf16 %v520_v20, %v519_v19  ;;  %v570_v30 = vld [vmem:[%s2341_s3 + $0x1a8] sm:$0xff]  ;;  %v521_v31 = vld [vmem:[%s2341_s3 + $0x20] sm:$0xff] }
  0x18   :  { %1195 = vmatmul.mubr.msk.f32.gmra.mrb[4].mxu1 %vm91_vm1, %v1785_v56  ;;  %211 = vmatprep.mubr.f32.mxu0 %v1610_v3  ;;  %v1500_v29 = vpack.c.bf16 %v552_v22, %v551_v21  ;;  %v522_v32 = vld [vmem:[%s2341_s3 + $0x28] sm:$0xff]  ;;  %v553_v33 = vld [vmem:[%s2341_s3 + $0x120] sm:$0xff]  ;;  %v540_v37 = vld [vmem:[%s2341_s3 + $0xb8] sm:$0xff]  ;;  %v1502_v38 = vpack.c.bf16 %v570_v30, %v569_v28 }
  0x19   :  { %300 = vmatprep.mubr.f32.mxu1 %v1610_v3  ;;  %1197 = vmatprep.subr.msk.mxu0 %vm104_vm0, %v64_v58  ;;  %v554_v34 = vld [vmem:[%s2341_s3 + $0x128] sm:$0xff]  ;;  %v1472_v39 = vpack.c.bf16 %v522_v32, %v521_v31  ;;  %v571_v40 = vld [vmem:[%s2341_s3 + $0x1b0] sm:$0xff]  ;;  %v572_v41 = vld [vmem:[%s2341_s3 + $0x1b8] sm:$0xff] }
  0x1a   :  { %1203 = vmatprep.subr.msk.mxu1 %vm104_vm0, %v66_v59  ;;  %1198 = vmatpush1.msk.msra.mxu0 %vm104_vm0, %v63_v60  ;;  %v1504_v42 = vpack.c.bf16 %v554_v34, %v553_v33  ;;  %v523_v43 = vld [vmem:[%s2341_s3 + $0x30] sm:$0xff]  ;;  %v524_v44 = vld [vmem:[%s2341_s3 + $0x38] sm:$0xff]  ;;  %v541_v48 = vld [vmem:[%s2341_s3 + $0xc0] sm:$0xff]  ;;  %v1506_v50 = vpack.c.bf16 %v572_v41, %v571_v40 }
  0x1b   :  { %1190 = vmatmul.mubr.msk.f32.gmra.mrb[6].mxu0 %vm91_vm1, %v1791_v57  ;;  %1204 = vmatpush1.msk.msra.mxu1 %vm104_vm0, %v65_v63  ;;  %v555_v45 = vld [vmem:[%s2341_s3 + $0x130] sm:$0xff]  ;;  %v556_v47 = vld [vmem:[%s2341_s3 + $0x138] sm:$0xff]  ;;  %v573_v51 = vld [vmem:[%s2341_s3 + $0x1c0] sm:$0xff]  ;;  %v1476_v53 = vpack.c.bf16 %v524_v44, %v523_v43 }
  0x1c   :  { %1196 = vmatmul.mubr.msk.f32.gmra.mrb[6].mxu1 %vm91_vm1, %v1791_v57  ;;  %371 = vmatprep.mubr.f32.mxu0 %v1610_v3  ;;  %v574_v52 = vld [vmem:[%s2341_s3 + $0x1c8] sm:$0xff]  ;;  %v1508_v54 = vpack.c.bf16 %v556_v47, %v555_v45  ;;  %v557_v58 = vld [vmem:[%s2341_s3 + $0x140] sm:$0xff]  ;;  %v543_v61 = vld [vmem:[%s2341_s3 + $0xd0] sm:$0xff] }
  0x1d   :  { %460 = vmatprep.mubr.f32.mxu1 %v1610_v3  ;;  %73 = vperm.xlu0 %1608, %v67_v2   ;;  %v1510_v59 = vpack.c.bf16 %v574_v52, %v573_v51  ;;  %v558_v60 = vld [vmem:[%s2341_s3 + $0x148] sm:$0xff]  ;;  %v544_v62 = vld [vmem:[%s2341_s3 + $0xd8] sm:$0xff]  ;;  %v575_v63 = vld [vmem:[%s2341_s3 + $0x1d0] sm:$0xff] }
  0x1e   :  { %83 = vperm.xlu1 %1609, %v69_v5   ;;  %1463 = vmatprep.subr.bf16.mxu0 %v1462_v4  ;;  %v1512_v1 = vpack.c.bf16 %v558_v60, %v557_v58  ;;  %v1482_v2 = vpack.c.bf16 %v544_v62, %v543_v61  ;;  %v527_v4 = vld [vmem:[%s2341_s3 + $0x50] sm:$0xff]  ;;  %v528_v5 = vld [vmem:[%s2341_s3 + $0x58] sm:$0xff]  ;;  %v545_v9 = vld [vmem:[%s2341_s3 + $0xe0] sm:$0xff] }
  0x1f   :  { %1199 = vmatmul.mubr.msk.f32.vlgmr.msra.gmra.mrb[8].mxu0 %vm91_vm1, %v1732_v36  ;;  %1495 = vmatprep.subr.bf16.mxu1 %v1494_v6  ;;  %v559_v6 = vld [vmem:[%s2341_s3 + $0x150] sm:$0xff]  ;;  %v560_v8 = vld [vmem:[%s2341_s3 + $0x158] sm:$0xff]  ;;  %v546_v10 = vld [vmem:[%s2341_s3 + $0xe8] sm:$0xff] }
  0x20   :  { %1205 = vmatmul.mubr.msk.f32.vlgmr.msra.gmra.mrb[8].mxu1 %vm91_vm1, %v1732_v36  ;;  %377 = vmatprep.mubr.f32.mxu0 %v1610_v3  ;;  %v539_v36 = vld [vmem:[%s2341_s3 + $0xb0] sm:$0xff]  ;;  %v1516_v14 = vpack.c.bf16 %v560_v8, %v559_v6  ;;  %v1486_v15 = vpack.c.bf16 %v546_v10, %v545_v9  ;;  %v529_v16 = vld [vmem:[%s2341_s3 + $0x60] sm:$0xff]  ;;  %v562_v20 = vld [vmem:[%s2341_s3 + $0x168] sm:$0xff] }
  0x21   :  { %466 = vmatprep.mubr.f32.mxu1 %v1610_v3  ;;  %78 = vperm.xlu0 %1608, %v68_v11   ;;  %v1474_v46 = vpack.c.bf16 %v540_v37, %v539_v36  ;;  %v577_v11 = vld [vmem:[%s2341_s3 + $0x1e0] sm:$0xff]  ;;  %v580_v27 = vld [vmem:[%s2341_s3 + $0x1f8] sm:$0xff]  ;;  %v531_v28 = vld [vmem:[%s2341_s3 + $0x70] sm:$0xff] }
  0x22   :  { %88 = vperm.xlu1 %1609, %v70_v12   ;;  %1465 = vmatpush3.bf16.msra.mxu0 %v1464_v13  ;;  %v578_v12 = vld [vmem:[%s2341_s3 + $0x1e8] sm:$0xff]  ;;  %v1484_v13 = vpack.c.bf16 %v528_v5, %v527_v4  ;;  %v561_v19 = vld [vmem:[%s2341_s3 + $0x160] sm:$0xff]  ;;  %v563_v32 = vld [vmem:[%s2341_s3 + $0x170] sm:$0xff] }
  0x23   :  { %1200 = vmatmul.mubr.msk.f32.gmra.mrb[10].mxu0 %vm91_vm1, %v1768_v49  ;;  %1497 = vmatpush3.bf16.msra.mxu1 %v1496_v17  ;;  %v530_v17 = vld [vmem:[%s2341_s3 + $0x68] sm:$0xff]  ;;  %v1518_v18 = vpack.c.bf16 %v578_v12, %v577_v11  ;;  %v1520_v22 = vpack.c.bf16 %v562_v20, %v561_v19  ;;  %v564_v33 = vld [vmem:[%s2341_s3 + $0x178] sm:$0xff]  ;;  %v629_v37 = vld [vmem:[%s2341_s3 + $0x380] sm:$0xff] }
  0x24   :  { %1206 = vmatmul.mubr.msk.f32.gmra.mrb[10].mxu1 %vm91_vm1, %v1768_v49  ;;  %383 = vmatprep.mubr.f32.mxu0 %v1610_v3  ;;  %v542_v49 = vld [vmem:[%s2341_s3 + $0xc8] sm:$0xff]  ;;  %v1488_v21 = vpack.c.bf16 %v530_v17, %v529_v16  ;;  %v1524_v34 = vpack.c.bf16 %v564_v33, %v563_v32  ;;  %v581_v43 = vld [vmem:[%s2341_s3 + $0x200] sm:$0xff]  ;;  %v615_v9 = vld [vmem:[%s2341_s3 + $0x310] sm:$0xff] }
  0x25   :  { %472 = vmatprep.mubr.f32.mxu1 %v1610_v3  ;;  %1467 = vmatprep.subr.bf16.mxu0 %v1466_v23  ;;  %v1478_v55 = vpack.c.bf16 %v542_v49, %v541_v48  ;;  %v547_v23 = vld [vmem:[%s2341_s3 + $0xf0] sm:$0xff]  ;;  %v598_v36 = vld [vmem:[%s2341_s3 + $0x288] sm:$0xff]  ;;  %v613_v48 = vld [vmem:[%s2341_s3 + $0x300] sm:$0xff] }
  0x26   :  { %1499 = vmatprep.subr.bf16.mxu1 %v1498_v24  ;;  %1469 = vmatpush3.bf16.msra.mxu0 %v1468_v25  ;;  %v548_v24 = vld [vmem:[%s2341_s3 + $0xf8] sm:$0xff]  ;;  %v579_v25 = vld [vmem:[%s2341_s3 + $0x1f0] sm:$0xff]  ;;  %v582_v47 = vld [vmem:[%s2341_s3 + $0x208] sm:$0xff] }
  0x27   :  { %1201 = vmatmul.mubr.msk.f32.gmra.mrb[12].mxu0 %vm91_vm1, %v1785_v56  ;;  %1501 = vmatpush3.bf16.msra.mxu1 %v1500_v29  ;;  %v1490_v26 = vpack.c.bf16 %v548_v24, %v547_v23  ;;  %v532_v29 = vld [vmem:[%s2341_s3 + $0x78] sm:$0xff]  ;;  %v1522_v30 = vpack.c.bf16 %v580_v27, %v579_v25  ;;  %v614_v49 = vld [vmem:[%s2341_s3 + $0x308] sm:$0xff]  ;;  %v585_v24 = vld [vmem:[%s2341_s3 + $0x220] sm:$0xff] }
  0x28   :  { %1207 = vmatmul.mubr.msk.f32.gmra.mrb[12].mxu1 %vm91_vm1, %v1785_v56  ;;  %389 = vmatprep.mubr.f32.mxu0 %v1610_v3  ;;  %v526_v56 = vld [vmem:[%s2341_s3 + $0x48] sm:$0xff]  ;;  %v1492_v31 = vpack.c.bf16 %v532_v29, %v531_v28  ;;  %v616_v10 = vld [vmem:[%s2341_s3 + $0x318] sm:$0xff] }
  0x29   :  { %478 = vmatprep.mubr.f32.mxu1 %v1610_v3  ;;  %1471 = vmatprep.subr.bf16.mxu0 %v1470_v35  ;;  %v525_v3 = vld [vmem:[%s2341_s3 + $0x40] sm:$0xff]  ;;  %v602_v16 = vld [vmem:[%s2341_s3 + $0x2a8] sm:$0xff]  ;;  %v1564_v23 = vpack.c.bf16 %v616_v10, %v615_v9 }
  0x2a   :  { %1503 = vmatprep.subr.bf16.mxu1 %v1502_v38  ;;  %1473 = vmatpush3.bf16.msra.mxu0 %v1472_v39  ;;  %v1480_v0 = vpack.c.bf16 %v526_v56, %v525_v3  ;;  %v597_v35 = vld [vmem:[%s2341_s3 + $0x280] sm:$0xff]  ;;  %v630_v39 = vld [vmem:[%s2341_s3 + $0x388] sm:$0xff]  ;;  %v631_v3 = vld [vmem:[%s2341_s3 + $0x390] sm:$0xff] }
  0x2b   :  { %1202 = vmatmul.mubr.msk.f32.gmra.mrb[14].mxu0 %vm91_vm1, %v1791_v57  ;;  %1505 = vmatpush3.bf16.msra.mxu1 %v1504_v42  ;;  %v1526_v38 = vpack.c.bf16 %v598_v36, %v597_v35  ;;  %v1558_v40 = vpack.c.bf16 %v630_v39, %v629_v37  ;;  %v632_v56 = vld [vmem:[%s2341_s3 + $0x398] sm:$0xff]  ;;  %v634_v19 = vld [vmem:[%s2341_s3 + $0x3a8] sm:$0xff] }
  0x2c   :  { %1208 = vmatmul.mubr.msk.f32.gmra.mrb[14].mxu1 %vm91_vm1, %v1791_v57  ;;  %1475 = vmatprep.subr.bf16.mxu0 %v1474_v46  ;;  %v576_v57 = vld [vmem:[%s2341_s3 + $0x1d8] sm:$0xff] }
  0x2d   :  { %1507 = vmatprep.subr.bf16.mxu1 %v1506_v50  ;;  %v1514_v7 = vpack.c.bf16 %v576_v57, %v575_v63  ;;  %v1528_v63 = vpack.c.bf16 %v582_v47, %v581_v43  ;;  %v1560_v57 = vpack.c.bf16 %v614_v49, %v613_v48 }
  0x2e   :  { %1477 = vmatpush3.bf16.msra.mxu0 %v1476_v53  ;;  %v599_v53 = vld [vmem:[%s2341_s3 + $0x290] sm:$0xff] }
  0x2f   :  { %1509 = vmatpush3.bf16.msra.mxu1 %v1508_v54  ;;  %1479 = vmatprep.subr.bf16.mxu0 %v1478_v55  ;;  %v600_v54 = vld [vmem:[%s2341_s3 + $0x298] sm:$0xff] }
  0x30   :  { %1511 = vmatprep.subr.bf16.mxu1 %v1510_v59  ;;  %v1530_v8 = vpack.c.bf16 %v600_v54, %v599_v53 }
  0x32   :  { %1481 = vmatpush3.bf16.msra.mxu0 %v1480_v0  ;;  %v583_v0 = vld [vmem:[%s2341_s3 + $0x210] sm:$0xff] }
  0x33   :  { %1513 = vmatpush3.bf16.msra.mxu1 %v1512_v1  ;;  %1483 = vmatprep.subr.bf16.mxu0 %v1482_v2  ;;  %v584_v1 = vld [vmem:[%s2341_s3 + $0x218] sm:$0xff] }
  0x34   :  { %1515 = vmatprep.subr.bf16.mxu1 %v1514_v7 }
  0x36   :  { %1485 = vmatpush3.bf16.msra.mxu0 %v1484_v13 }
  0x37   :  { %1517 = vmatpush3.bf16.msra.mxu1 %v1516_v14  ;;  %1487 = vmatprep.subr.bf16.mxu0 %v1486_v15  ;;  %v1562_v14 = vpack.c.bf16 %v632_v56, %v631_v3  ;;  %v601_v15 = vld [vmem:[%s2341_s3 + $0x2a0] sm:$0xff]  ;;  %v587_v3 = vld [vmem:[%s2341_s3 + $0x230] sm:$0xff]  ;;  %v588_v56 = vld [vmem:[%s2341_s3 + $0x238] sm:$0xff] }
  0x38   :  { %1519 = vmatprep.subr.bf16.mxu1 %v1518_v18  ;;  %v633_v18 = vld [vmem:[%s2341_s3 + $0x3a0] sm:$0xff]  ;;  %v1534_v29 = vpack.c.bf16 %v602_v16, %v601_v15 }
  0x39   :  { %v1566_v36 = vpack.c.bf16 %v634_v19, %v633_v18  ;;  %v589_v18 = vld [vmem:[%s2341_s3 + $0x240] sm:$0xff]  ;;  %v590_v19 = vld [vmem:[%s2341_s3 + $0x248] sm:$0xff] }
  0x3a   :  { %1489 = vmatpush3.bf16.msra.mxu0 %v1488_v21 }
  0x3b   :  { %1521 = vmatpush3.bf16.msra.mxu1 %v1520_v22  ;;  %1491 = vmatprep.subr.bf16.mxu0 %v1490_v26  ;;  %v1532_v22 = vpack.c.bf16 %v584_v1, %v583_v0  ;;  %v620_v0 = vld [vmem:[%s2341_s3 + $0x338] sm:$0xff] }
  0x3c   :  { %1523 = vmatprep.subr.bf16.mxu1 %v1522_v30  ;;  %v586_v30 = vld [vmem:[%s2341_s3 + $0x228] sm:$0xff] }
  0x3d   :  { %v1536_v49 = vpack.c.bf16 %v586_v30, %v585_v24  ;;  %v622_v24 = vld [vmem:[%s2341_s3 + $0x348] sm:$0xff] }
  0x3e   :  { %1493 = vmatpush3.bf16.msra.mxu0 %v1492_v31  ;;  %v617_v31 = vld [vmem:[%s2341_s3 + $0x320] sm:$0xff] }
  0x3f   :  { %1525 = vmatpush3.bf16.msra.mxu1 %v1524_v34  ;;  %1527 = vmatprep.subr.bf16.mxu0 %v1526_v38  ;;  %v618_v38 = vld [vmem:[%s2341_s3 + $0x328] sm:$0xff] }
  0x40   :  { %1559 = vmatprep.subr.bf16.mxu1 %v1558_v40  ;;  %v603_v40 = vld [vmem:[%s2341_s3 + $0x2b0] sm:$0xff]  ;;  %v1568_v54 = vpack.c.bf16 %v618_v38, %v617_v31 }
  0x9c   :  { %v2059_v41 = vpop.permute.xlu0 %73 }
  0x9d   :  { %v2089_v58 = vpop.permute.xlu1 %83 }
  0xa0   :  { %v2091_v60 = vpop.permute.xlu0 %78 }
  0xa1   :  { %v2132_v37 = vpop.permute.xlu1 %88 }
  0xe2   :  { %v195_v42 = vpop.f32.mrb[0].mxu0 }
  0xe3   :  { %v196_v44 = vadd.f32 %v195_v42, %v2059_v41  ;;  %v284_v45 = vpop.f32.mrb[0].mxu1  ;;  %v197_v46 = vpop.f32.mrb[1].mxu0  ;;  %v604_v42 = vld [vmem:[%s2341_s3 + $0x2b8] sm:$0xff] }
  0xe4   :  { %v285_v50 = vadd.f32 %v284_v45, %v2059_v41  ;;  %v198_v51 = vadd.f32 %v197_v46, %v2059_v41  ;;  %v286_v52 = vpop.f32.mrb[1].mxu1  ;;  %v635_v45 = vld [vmem:[%s2341_s3 + $0x3b0] sm:$0xff]  ;;  %v636_v46 = vld [vmem:[%s2341_s3 + $0x3b8] sm:$0xff] }
  0xe5   :  { %v287_v55 = vadd.f32 %v286_v52, %v2059_v41  ;;  %v485_v2 = vmax.f32 %v196_v44, 0.0 }
  0xe6   :  { %v487_v59 = vmax.f32 %v285_v50, 0.0  ;;  %v486_v61 = vmax.f32 %v198_v51, 0.0  ;;  %v201_v62 = vpop.f32.mrb[2].mxu0 }
  0xe7   :  { %v488_v4 = vmax.f32 %v287_v55, 0.0  ;;  %v202_v5 = vadd.f32 %v201_v62, %v2091_v60  ;;  %v290_v6 = vpop.f32.mrb[2].mxu1  ;;  %v203_v7 = vpop.f32.mrb[3].mxu0  ;;  %v1538_v55 = vpack.c.bf16 %v604_v42, %v603_v40  ;;  %v592_v40 = vld [vmem:[%s2341_s3 + $0x258] sm:$0xff]  ;;  %v623_v42 = vld [vmem:[%s2341_s3 + $0x350] sm:$0xff] }
  0xe8   :  { %v291_v11 = vadd.f32 %v290_v6, %v2091_v60  ;;  %v204_v12 = vadd.f32 %v203_v7, %v2091_v60  ;;  %v292_v13 = vpop.f32.mrb[3].mxu1  ;;  %709 = vmatprep.mubr.f32.mxu0 %v486_v61  ;;  %v637_v7 = vld [vmem:[%s2341_s3 + $0x3c0] sm:$0xff] }
  0xe9   :  { %v293_v17 = vadd.f32 %v292_v13, %v2091_v60  ;;  %794 = vmatprep.mubr.f32.mxu1 %v488_v4  ;;  %710 = vmatmul.mubr.f32.vlgmr.msra.gmra.mrb[16].mxu0 %v485_v2  ;;  %v493_v25 = vmax.f32 %v202_v5, 0.0  ;;  %v605_v2 = vld [vmem:[%s2341_s3 + $0x2c0] sm:$0xff]  ;;  %v606_v4 = vld [vmem:[%s2341_s3 + $0x2c8] sm:$0xff] }
  0xea   :  { %v494_v20 = vmax.f32 %v204_v12, 0.0  ;;  %795 = vmatmul.mubr.f32.vlgmr.msra.gmra.mrb[16].mxu1 %v487_v59  ;;  %1529 = vmatpush3.bf16.msra.mxu0 %v1528_v63  ;;  %v207_v21 = vpop.f32.mrb[4].mxu0  ;;  %v495_v33 = vmax.f32 %v291_v11, 0.0  ;;  %v619_v59 = vld [vmem:[%s2341_s3 + $0x330] sm:$0xff]  ;;  %v1540_v11 = vpack.c.bf16 %v588_v56, %v587_v3  ;;  %v593_v3 = vld [vmem:[%s2341_s3 + $0x260] sm:$0xff]  ;;  %v594_v56 = vld [vmem:[%s2341_s3 + $0x268] sm:$0xff] }
  0xeb   :  { %v496_v26 = vmax.f32 %v293_v17, 0.0  ;;  %1561 = vmatpush3.bf16.msra.mxu1 %v1560_v57  ;;  %v296_v27 = vpop.f32.mrb[4].mxu1  ;;  %1531 = vmatprep.subr.bf16.mxu0 %v1530_v8  ;;  %v209_v28 = vpop.f32.mrb[5].mxu0  ;;  %v208_v32 = vadd.f32 %v207_v21, %v2089_v58  ;;  %v1570_v57 = vpack.c.bf16 %v636_v46, %v635_v45  ;;  %v638_v8 = vld [vmem:[%s2341_s3 + $0x3c8] sm:$0xff]  ;;  %v1572_v16 = vpack.c.bf16 %v620_v0, %v619_v59  ;;  %v624_v45 = vld [vmem:[%s2341_s3 + $0x358] sm:$0xff]  ;;  %v609_v46 = vld [vmem:[%s2341_s3 + $0x2e0] sm:$0xff] }
  0xec   :  { %714 = vmatprep.mubr.f32.mxu0 %v494_v20  ;;  %1563 = vmatprep.subr.bf16.mxu1 %v1562_v14  ;;  %v210_v34 = vadd.f32 %v209_v28, %v2089_v58  ;;  %v298_v35 = vpop.f32.mrb[5].mxu1  ;;  %v297_v39 = vadd.f32 %v296_v27, %v2089_v58  ;;  %v1542_v17 = vpack.c.bf16 %v606_v4, %v605_v2  ;;  %v621_v20 = vld [vmem:[%s2341_s3 + $0x340] sm:$0xff]  ;;  %v639_v28 = vld [vmem:[%s2341_s3 + $0x3d0] sm:$0xff]  ;;  %v612_v0 = vld [vmem:[%s2341_s3 + $0x2f8] sm:$0xff] }
  0xed   :  { %799 = vmatprep.mubr.f32.mxu1 %v496_v26  ;;  %v299_v43 = vadd.f32 %v298_v35, %v2089_v58  ;;  %715 = vmatmul.mubr.f32.gmra.mrb[18].mxu0 %v493_v25  ;;  %v501_v44 = vmax.f32 %v208_v32, 0.0  ;;  %v607_v25 = vld [vmem:[%s2341_s3 + $0x2d0] sm:$0xff]  ;;  %v608_v26 = vld [vmem:[%s2341_s3 + $0x2d8] sm:$0xff]  ;;  %v1544_v32 = vpack.c.bf16 %v590_v19, %v589_v18  ;;  %v625_v59 = vld [vmem:[%s2341_s3 + $0x360] sm:$0xff] }
  0xee   :  { %v502_v47 = vmax.f32 %v210_v34, 0.0  ;;  %800 = vmatmul.mubr.f32.gmra.mrb[18].mxu1 %v495_v33  ;;  %1533 = vmatpush3.bf16.msra.mxu0 %v1532_v22  ;;  %v213_v48 = vpop.f32.mrb[6].mxu0  ;;  %v503_v50 = vmax.f32 %v297_v39, 0.0  ;;  %v1546_v38 = vpack.c.bf16 %v608_v26, %v607_v25  ;;  %v591_v39 = vld [vmem:[%s2341_s3 + $0x250] sm:$0xff]  ;;  %v644_v2 = vld [vmem:[%s2341_s3 + $0x3f8] sm:$0xff] }
  0xef   :  { %v504_v51 = vmax.f32 %v299_v43, 0.0  ;;  %1565 = vmatpush3.bf16.msra.mxu1 %v1564_v23  ;;  %v302_v52 = vpop.f32.mrb[6].mxu1  ;;  %1535 = vmatprep.subr.bf16.mxu0 %v1534_v29  ;;  %v215_v53 = vpop.f32.mrb[7].mxu0  ;;  %v214_v61 = vadd.f32 %v213_v48, %v2132_v37  ;;  %v1574_v23 = vpack.c.bf16 %v638_v8, %v637_v7  ;;  %v640_v29 = vld [vmem:[%s2341_s3 + $0x3d8] sm:$0xff]  ;;  %v641_v48 = vld [vmem:[%s2341_s3 + $0x3e0] sm:$0xff] }
  0xf0   :  { %1567 = vmatprep.subr.bf16.mxu1 %v1566_v36  ;;  %v216_v62 = vadd.f32 %v215_v53, %v2132_v37  ;;  %v304_v63 = vpop.f32.mrb[7].mxu1  ;;  %719 = vmatprep.mubr.f32.mxu0 %v502_v47  ;;  %v303_v1 = vadd.f32 %v302_v52, %v2132_v37  ;;  %v1576_v36 = vpack.c.bf16 %v622_v24, %v621_v20  ;;  %v610_v47 = vld [vmem:[%s2341_s3 + $0x2e8] sm:$0xff] }
  0xf1   :  { %v305_v5 = vadd.f32 %v304_v63, %v2132_v37  ;;  %804 = vmatprep.mubr.f32.mxu1 %v504_v51  ;;  %720 = vmatmul.mubr.f32.gmra.mrb[20].mxu0 %v501_v44  ;;  %v509_v6 = vmax.f32 %v214_v61, 0.0  ;;  %v1578_v44 = vpack.c.bf16 %v640_v29, %v639_v28  ;;  %v1548_v51 = vpack.c.bf16 %v592_v40, %v591_v39  ;;  %v626_v63 = vld [vmem:[%s2341_s3 + $0x368] sm:$0xff] }
  0xf2   :  { %v510_v9 = vmax.f32 %v216_v62, 0.0  ;;  %1537 = vmatpush3.bf16.msra.mxu0 %v1536_v49  ;;  %v2179_v10 = vpop.f32.mrb[8].mxu0  ;;  %805 = vmatmul.mubr.f32.gmra.mrb[20].mxu1 %v503_v50  ;;  %v511_v12 = vmax.f32 %v303_v1, 0.0  ;;  %v642_v49 = vld [vmem:[%s2341_s3 + $0x3e8] sm:$0xff]  ;;  %v643_v1 = vld [vmem:[%s2341_s3 + $0x3f0] sm:$0xff]  ;;  %v1584_v8 = vpack.c.bf16 %v626_v63, %v625_v59 }
  0xf3   :  { %v512_v13 = vmax.f32 %v305_v5, 0.0  ;;  %1569 = vmatpush3.bf16.msra.mxu1 %v1568_v54  ;;  %v2181_v14 = vpop.f32.mrb[8].mxu1  ;;  %v375_v15 = vpop.f32.mrb[9].mxu0  ;;  %1539 = vmatprep.subr.bf16.mxu0 %v1538_v55  ;;  %v1580_v54 = vpack.c.bf16 %v624_v45, %v623_v42  ;;  %v1550_v55 = vpack.c.bf16 %v610_v47, %v609_v46  ;;  %v1582_v62 = vpack.c.bf16 %v642_v49, %v641_v48  ;;  %v985_v45 = vld [vmem:[%s2343_s4] sm:$0xff] }
  0xf4   :  { %v376_v21 = vadd.f32 %v375_v15, %v2059_v41  ;;  %v464_v22 = vpop.f32.mrb[9].mxu1  ;;  %1571 = vmatprep.subr.bf16.mxu1 %v1570_v57  ;;  %724 = vmatprep.mubr.f32.mxu0 %v510_v9  ;;  %v611_v57 = vld [vmem:[%s2341_s3 + $0x2f0] sm:$0xff]  ;;  %v1552_v5 = vpack.c.bf16 %v594_v56, %v593_v3  ;;  %v1586_v15 = vpack.c.bf16 %v644_v2, %v643_v1 }
  0xf5   :  { %v465_v27 = vadd.f32 %v464_v22, %v2059_v41  ;;  %809 = vmatprep.mubr.f32.mxu1 %v512_v13  ;;  %725 = vmatmul.mubr.f32.gmra.mrb[22].mxu0 %v509_v6  ;;  %v1554_v9 = vpack.c.bf16 %v612_v0, %v611_v57  ;;  %v374_v19 = vadd.f32 %v2179_v10, %v2059_v41 }
  0xf6   :  { %v490_v30 = vmax.f32 %v376_v21, 0.0  ;;  %1541 = vmatpush3.bf16.msra.mxu0 %v1540_v11  ;;  %v2209_v31 = vpop.f32.mrb[10].mxu0  ;;  %810 = vmatmul.mubr.f32.gmra.mrb[22].mxu1 %v511_v12  ;;  %v595_v11 = vld [vmem:[%s2341_s3 + $0x270] sm:$0xff]  ;;  %v596_v12 = vld [vmem:[%s2341_s3 + $0x278] sm:$0xff]  ;;  %v463_v21 = vadd.f32 %v2181_v14, %v2059_v41 }
  0xf7   :  { %v492_v33 = vmax.f32 %v465_v27, 0.0  ;;  %1573 = vmatpush3.bf16.msra.mxu1 %v1572_v16  ;;  %v2211_v34 = vpop.f32.mrb[10].mxu1  ;;  %v381_v35 = vpop.f32.mrb[11].mxu0  ;;  %1543 = vmatprep.subr.bf16.mxu0 %v1542_v17  ;;  %v627_v16 = vld [vmem:[%s2341_s3 + $0x370] sm:$0xff]  ;;  %v628_v17 = vld [vmem:[%s2341_s3 + $0x378] sm:$0xff]  ;;  %v1556_v18 = vpack.c.bf16 %v596_v12, %v595_v11  ;;  %v489_v24 = vmax.f32 %v374_v19, 0.0  ;;  %v380_v25 = vadd.f32 %v2209_v31, %v2091_v60 }
  0xf8   :  { %v470_v43 = vpop.f32.mrb[11].mxu1  ;;  %879 = vmatprep.mubr.f32.mxu0 %v490_v30  ;;  %1575 = vmatprep.subr.bf16.mxu1 %v1574_v23  ;;  %v1588_v20 = vpack.c.bf16 %v628_v17, %v627_v16  ;;  %v382_v22 = vadd.f32 %v381_v35, %v2091_v60  ;;  %v491_v26 = vmax.f32 %v463_v21, 0.0  ;;  %v469_v10 = vadd.f32 %v2211_v34, %v2091_v60 }
  0xf9   :  { %964 = vmatprep.mubr.f32.mxu1 %v492_v33  ;;  %v471_v23 = vadd.f32 %v470_v43, %v2091_v60  ;;  %v497_v14 = vmax.f32 %v380_v25, 0.0 }
  0xfa   :  { %1545 = vmatpush3.bf16.msra.mxu0 %v1544_v32  ;;  %v385_v50 = vpop.f32.mrb[12].mxu0  ;;  %v498_v27 = vmax.f32 %v382_v22, 0.0  ;;  %v499_v32 = vmax.f32 %v469_v10, 0.0 }
  0xfb   :  { %1577 = vmatpush3.bf16.msra.mxu1 %v1576_v36  ;;  %v474_v52 = vpop.f32.mrb[12].mxu1  ;;  %v387_v53 = vpop.f32.mrb[13].mxu0  ;;  %1547 = vmatprep.subr.bf16.mxu0 %v1546_v38  ;;  %v500_v29 = vmax.f32 %v471_v23, 0.0  ;;  %v386_v30 = vadd.f32 %v385_v50, %v2089_v58 }
  0xfc   :  { %v476_v61 = vpop.f32.mrb[13].mxu1  ;;  %1579 = vmatprep.subr.bf16.mxu1 %v1578_v44  ;;  %v388_v28 = vadd.f32 %v387_v53, %v2089_v58  ;;  %v475_v31 = vadd.f32 %v474_v52, %v2089_v58 }
  0xfd   :  { %v477_v41 = vadd.f32 %v476_v61, %v2089_v58  ;;  %v505_v36 = vmax.f32 %v386_v30, 0.0 }
  0xfe   :  { %1549 = vmatpush3.bf16.msra.mxu0 %v1548_v51  ;;  %v391_v4 = vpop.f32.mrb[14].mxu0  ;;  %v506_v33 = vmax.f32 %v388_v28, 0.0  ;;  %v507_v39 = vmax.f32 %v475_v31, 0.0 }
  0xff   :  { %1581 = vmatpush3.bf16.msra.mxu1 %v1580_v54  ;;  %v480_v6 = vpop.f32.mrb[14].mxu1  ;;  %v393_v7 = vpop.f32.mrb[15].mxu0  ;;  %1551 = vmatprep.subr.bf16.mxu0 %v1550_v55  ;;  %v508_v60 = vmax.f32 %v477_v41, 0.0  ;;  %v392_v38 = vadd.f32 %v391_v4, %v2132_v37 }
 0x100   :  { %v482_v13 = vpop.f32.mrb[15].mxu1  ;;  %1583 = vmatprep.subr.bf16.mxu1 %v1582_v62  ;;  %v394_v35 = vadd.f32 %v393_v7, %v2132_v37  ;;  %v481_v40 = vadd.f32 %v480_v6, %v2132_v37 }
 0x101   :  { %v483_v34 = vadd.f32 %v482_v13, %v2132_v37  ;;  %v513_v58 = vmax.f32 %v392_v38, 0.0 }
 0x102   :  { %1553 = vmatpush3.bf16.msra.mxu0 %v1552_v5  ;;  %v514_v42 = vmax.f32 %v394_v35, 0.0  ;;  %v515_v44 = vmax.f32 %v481_v40, 0.0 }
 0x103   :  { %1585 = vmatpush3.bf16.msra.mxu1 %v1584_v8  ;;  %1555 = vmatprep.subr.bf16.mxu0 %v1554_v9  ;;  %v516_v43 = vmax.f32 %v483_v34, 0.0 }
 0x104   :  { %1587 = vmatprep.subr.bf16.mxu1 %v1586_v15 }
 0x106   :  { %1557 = vmatpush3.bf16.msra.mxu0 %v1556_v18 }
 0x107   :  { %1589 = vmatpush3.bf16.msra.mxu1 %v1588_v20 }
 0x109   :  { %880 = vmatmul.mubr.f32.vlgmr.msra.gmra.mrb[24].mxu0 %v489_v24 }
 0x10a   :  { %965 = vmatmul.mubr.f32.vlgmr.msra.gmra.mrb[24].mxu1 %v491_v26  ;;  %884 = vmatprep.mubr.f32.mxu0 %v498_v27 }
 0x10b   :  { %969 = vmatprep.mubr.f32.mxu1 %v500_v29 }
 0x10d   :  { %885 = vmatmul.mubr.f32.gmra.mrb[26].mxu0 %v497_v14 }
 0x10e   :  { %970 = vmatmul.mubr.f32.gmra.mrb[26].mxu1 %v499_v32  ;;  %889 = vmatprep.mubr.f32.mxu0 %v506_v33 }
 0x10f   :  { %974 = vmatprep.mubr.f32.mxu1 %v508_v60 }
 0x111   :  { %890 = vmatmul.mubr.f32.gmra.mrb[28].mxu0 %v505_v36 }
 0x112   :  { %975 = vmatmul.mubr.f32.gmra.mrb[28].mxu1 %v507_v39  ;;  %894 = vmatprep.mubr.f32.mxu0 %v514_v42 }
 0x113   :  { %979 = vmatprep.mubr.f32.mxu1 %v516_v43 }
 0x115   :  { %895 = vmatmul.mubr.f32.gmra.mrb[30].mxu0 %v513_v58 }
 0x116   :  { %980 = vmatmul.mubr.f32.gmra.mrb[30].mxu1 %v515_v44  ;;  %1413 = vmatprep.mubr.msk.f32.mxu0 %vm989_vm2, %v985_v45  ;;  %v986_v44 = vld [vmem:[%s2343_s4 + $0x8] sm:$0xff]  ;;  %v987_v45 = vld [vmem:[%s2343_s4 + $0x10] sm:$0xff] }
 0x1bc   :  { %v1247_v46 = vpop.f32.mrb[16].mxu0 }
 0x1bd   :  { %v1291_v47 = vpop.f32.mrb[16].mxu1  ;;  %v1248_v37 = vpop.f32.mrb[17].mxu0 }
 0x1be   :  { %v1249_v48 = vadd.f32 %v1248_v37, %v1247_v46  ;;  %v1292_v49 = vpop.f32.mrb[17].mxu1  ;;  %v988_v46 = vld [vmem:[%s2343_s4 + $0x18] sm:$0xff] }
 0x1bf   :  { %v1293_v50 = vadd.f32 %v1292_v49, %v1291_v47  ;;  %v1091_v47 = vld [vmem:[%s2345_s5] sm:$0xff] }
 0x1c0   :  { %v1250_v51 = vpop.f32.mrb[18].mxu0  ;;  %1427 = vmatprep.mubr.msk.f32.mxu1 %vm989_vm2, %v1091_v47 }
 0x1c1   :  { %v797_v52 = vadd.f32 %v1293_v50, %v1249_v48  ;;  %v1294_v53 = vpop.f32.mrb[18].mxu1  ;;  %v1251_v54 = vpop.f32.mrb[19].mxu0 }
 0x1c2   :  { %v1252_v55 = vadd.f32 %v1251_v54, %v1250_v51  ;;  %v1295_v3 = vpop.f32.mrb[19].mxu1 }
 0x1c3   :  { %v1296_v56 = vadd.f32 %v1295_v3, %v1294_v53 }
 0x1c4   :  { %v1253_v59 = vpop.f32.mrb[20].mxu0 }
 0x1c5   :  { %v802_v61 = vadd.f32 %v1296_v56, %v1252_v55  ;;  %v1297_v62 = vpop.f32.mrb[20].mxu1  ;;  %v1254_v63 = vpop.f32.mrb[21].mxu0  ;;  %v1092_v56 = vld [vmem:[%s2345_s5 + $0x8] sm:$0xff] }
 0x1c6   :  { %v1255_v57 = vadd.f32 %v1254_v63, %v1253_v59  ;;  %v1298_v0 = vpop.f32.mrb[21].mxu1 }
 0x1c7   :  { %v1299_v1 = vadd.f32 %v1298_v0, %v1297_v62 }
 0x1c8   :  { %v1256_v2 = vpop.f32.mrb[22].mxu0 }
 0x1c9   :  { %v807_v4 = vadd.f32 %v1299_v1, %v1255_v57  ;;  %v1300_v5 = vpop.f32.mrb[22].mxu1  ;;  %v1257_v6 = vpop.f32.mrb[23].mxu0 }
 0x1ca   :  { %v1258_v7 = vadd.f32 %v1257_v6, %v1256_v2  ;;  %v1301_v8 = vpop.f32.mrb[23].mxu1 }
 0x1cb   :  { %v1302_v9 = vadd.f32 %v1301_v8, %v1300_v5 }
 0x1cd   :  { %v812_v11 = vadd.f32 %v1302_v9, %v1258_v7 }
 0x1dc   :  { %v1335_v12 = vpop.f32.mrb[24].mxu0 }
 0x1dd   :  { %v1379_v13 = vpop.f32.mrb[24].mxu1  ;;  %v1336_v15 = vpop.f32.mrb[25].mxu0 }
 0x1de   :  { %v1337_v16 = vadd.f32 %v1336_v15, %v1335_v12  ;;  %v1380_v17 = vpop.f32.mrb[25].mxu1 }
 0x1df   :  { %v1381_v18 = vadd.f32 %v1380_v17, %v1379_v13 }
 0x1e0   :  { %v882_v19 = vadd.f32 %v1337_v16, %v797_v52  ;;  %v1338_v20 = vpop.f32.mrb[26].mxu0 }
 0x1e1   :  { %v1382_v21 = vpop.f32.mrb[26].mxu1  ;;  %v1339_v22 = vpop.f32.mrb[27].mxu0 }
 0x1e2   :  { %v967_v23 = vadd.f32 %v1381_v18, %v882_v19  ;;  %v1340_v24 = vadd.f32 %v1339_v22, %v1338_v20  ;;  %v1383_v25 = vpop.f32.mrb[27].mxu1 }
 0x1e3   :  { %v1384_v26 = vadd.f32 %v1383_v25, %v1382_v21 }
 0x1e4   :  { %1175 = vst.msk [vmem:[%s2344_s6] sm:$0xff] %vm1174_vm3, %v967_v23  ;;  %v887_v10 = vadd.f32 %v1340_v24, %v802_v61  ;;  %v1341_v27 = vpop.f32.mrb[28].mxu0 }
 0x1e5   :  { %v1385_v28 = vpop.f32.mrb[28].mxu1  ;;  %v1342_v29 = vpop.f32.mrb[29].mxu0 }
 0x1e6   :  { %v972_v41 = vadd.f32 %v1384_v26, %v887_v10  ;;  %v1343_v14 = vadd.f32 %v1342_v29, %v1341_v27  ;;  %v1386_v30 = vpop.f32.mrb[29].mxu1 }
 0x1e7   :  { %v1387_v32 = vadd.f32 %v1386_v30, %v1385_v28 }
 0x1e8   :  { %1176 = vst.msk [vmem:[%s2344_s6 + $0x8] sm:$0xff] %vm1174_vm3, %v972_v41  ;;  %v892_v31 = vadd.f32 %v1343_v14, %v807_v4  ;;  %v1344_v33 = vpop.f32.mrb[30].mxu0  ;;  %v1590_v35 = vpack.c.bf16 %v972_v41, %v967_v23 }
 0x1e9   :  { %v1388_v60 = vpop.f32.mrb[30].mxu1  ;;  %v1345_v34 = vpop.f32.mrb[31].mxu0 }
 0x1ea   :  { %v977_v36 = vadd.f32 %v1387_v32, %v892_v31  ;;  %v1346_v38 = vadd.f32 %v1345_v34, %v1344_v33  ;;  %v1389_v39 = vpop.f32.mrb[31].mxu1  ;;  %1591 = vmatprep.subr.bf16.mxu0 %v1590_v35 }
 0x1eb   :  { %v1390_v40 = vadd.f32 %v1389_v39, %v1388_v60  ;;  %1593 = vmatpush3.bf16.msra.mxu0 %v1590_v35 }
 0x1ec   :  { %1177 = vst.msk [vmem:[%s2344_s6 + $0x10] sm:$0xff] %vm1174_vm3, %v977_v36  ;;  %v897_v42 = vadd.f32 %v1346_v38, %v812_v11 }
 0x1ee   :  { %v982_v43 = vadd.f32 %v1390_v40, %v897_v42 }
 0x1f0   :  { %1178 = vst.msk [vmem:[%s2344_s6 + $0x18] sm:$0xff] %vm1174_vm3, %v982_v43  ;;  %v1594_v58 = vpack.c.bf16 %v982_v43, %v977_v36 }
 0x1f2   :  { %1595 = vmatprep.subr.bf16.mxu0 %v1594_v58 }
 0x1f3   :  { %1597 = vmatpush3.bf16.msra.mxu0 %v1594_v58 }
 0x1f6   :  { %1414 = vmatmul.mubr.msk.f32.vlgmr.msra.gmra.mrb[32].mxu0 %vm989_vm2, %v986_v44 }
 0x1f7   :  { %1416 = vmatprep.mubr.msk.f32.mxu0 %vm989_vm2, %v987_v45 }
 0x1fa   :  { %1417 = vmatmul.mubr.msk.f32.gmra.mrb[34].mxu0 %vm989_vm2, %v988_v46 }
 0x2c9   :  { %v1415_v37 = vpop.f32.mrb[32].mxu0 }
 0x2ca   :  { %v1088_v48 = vmax.f32 %v1415_v37, 0.0  ;;  %v1068_v49 = vpop.f32.mrb[33].mxu0 }
 0x2cb   :  { %v1087_v50 = vmax.f32 %v1068_v49, 0.0 }
 0x2cd   :  { %v1598_v51 = vpack.c.bf16 %v1088_v48, %v1087_v50  ;;  %v1418_v52 = vpop.f32.mrb[34].mxu0 }
 0x2ce   :  { %v1090_v53 = vmax.f32 %v1418_v52, 0.0  ;;  %v1078_v54 = vpop.f32.mrb[35].mxu0 }
 0x2cf   :  { %1599 = vmatprep.subr.bf16.mxu1 %v1598_v51  ;;  %v1089_v55 = vmax.f32 %v1078_v54, 0.0 }
 0x2d0   :  { %1601 = vmatpush3.bf16.msra.mxu1 %v1598_v51 }
 0x2d1   :  { %v1602_v3 = vpack.c.bf16 %v1090_v53, %v1089_v55 }
 0x2d3   :  { %1603 = vmatprep.subr.bf16.mxu1 %v1602_v3 }
 0x2d4   :  { %1605 = vmatpush3.bf16.msra.mxu1 %v1602_v3 }
 0x2d7   :  { %1428 = vmatmul.mubr.msk.f32.vlgmr.msra.gmra.mrb[32].mxu1 %vm989_vm2, %v1092_v56 }
 0x3aa   :  { %v1429_v59 = vpop.f32.mrb[32].mxu1 }
 0x3ab   :  { %1180 = vst.msk [vmem:[%s2344_s6 + $0x28] sm:$0xff] %vm1174_vm3, %v1429_v59  ;;  %v1165_v61 = vpop.f32.mrb[33].mxu1 }
 0x3ac   :  { %1179 = vst.msk [vmem:[%s2344_s6 + $0x20] sm:$0xff] %vm1174_vm3, %v1165_v61 }

</bundles_post_ra>
